<compile_context>
chip_gen: v7x
topology: tpu7x:2x2x1
jax: 0.10.0
libtpu: 0.0.40
codegen_flags: <defaults>
</compile_context>

<pallas_src>
import jax
import jax.numpy as jnp
from jax.experimental import pallas as pl
from jax.experimental.pallas import tpu as pltpu

_SUBLANE = 8    # f32 sublanes per vreg
_LANE = 128     # lanes per vreg


def _round_up(x, m):
    return ((x + m - 1) // m) * m


# ----------------------------- fused MLP kernel ------------------------------
def mlp_kernel(x_ref, w1_ref, b1_ref, w2_ref, b2_ref, o_ref):
    """o = relu(x @ W1 + b1) @ W2 + b2 for one batch tile; all refs in VMEM.

    x_ref  : (TB, look_back)
    w1_ref : (look_back, H)      layer_a weight, pre-transposed (in, out)
    b1_ref : (1, H)
    w2_ref : (H, O_pad)          output weight, pre-transposed + lane-padded
    b2_ref : (1, O_pad)
    o_ref  : (TB, O_pad)         lane-dense output tile
    """
    x = x_ref[...].astype(jnp.float32)
    h = jnp.dot(x, w1_ref[...], preferred_element_type=jnp.float32) + b1_ref[...]
    h = jnp.maximum(h, 0.0)                                  # ReLU on the VPU (f32)
    y = jnp.dot(h, w2_ref[...], preferred_element_type=jnp.float32) + b2_ref[...]
    o_ref[...] = y.astype(o_ref.dtype)


# --------------------------------- wrapper ------------------------------------
def lstm_predictor_forward(x, params, *, max_rows_per_block=1024):
    """Mirrors LSTMPredictor.forward: output(relu(layer_a(x)))."""
    B, look_back = x.shape
    H = params["w1"].shape[-1]
    O = params["w2"].shape[-1]

    # --- sublane-align the batch and pick a row-block size ---
    B_pad = _round_up(max(B, _SUBLANE), _SUBLANE)
    tb = min(int(max_rows_per_block), B_pad)
    tb = _round_up(tb, _SUBLANE)
    B_pad = _round_up(B_pad, tb)
    if B_pad != B:
        x = jnp.pad(x, ((0, B_pad - B), (0, 0)))

    # --- lane-dense output: pad target_days to a multiple of 128 ---
    O_pad = _round_up(O, _LANE)
    w2, b2 = params["w2"], params["b2"]
    if O_pad != O:
        w2 = jnp.pad(w2, ((0, 0), (0, O_pad - O)))
        b2 = jnp.pad(b2, ((0, 0), (0, O_pad - O)))

    grid = (B_pad // tb,)

    itemsize = x.dtype.itemsize
    flops = 2 * B_pad * (look_back * H + H * O_pad)
    bytes_accessed = (
        B_pad * look_back * itemsize           # x
        + look_back * H * 4 + H * 4            # W1, b1
        + H * O_pad * 4 + O_pad * 4            # W2, b2
        + B_pad * O_pad * 4                    # out
    )

    out = pl.pallas_call(
        mlp_kernel,
        out_shape=jax.ShapeDtypeStruct((B_pad, O_pad), jnp.float32),
        grid=grid,
        in_specs=[
            pl.BlockSpec((tb, look_back), lambda i: (i, 0)),   # x: tiled over B
            pl.BlockSpec((look_back, H), lambda i: (0, 0)),    # W1: VMEM-resident
            pl.BlockSpec((1, H), lambda i: (0, 0)),            # b1: VMEM-resident
            pl.BlockSpec((H, O_pad), lambda i: (0, 0)),        # W2: VMEM-resident
            pl.BlockSpec((1, O_pad), lambda i: (0, 0)),        # b2: VMEM-resident
        ],
        out_specs=pl.BlockSpec((tb, O_pad), lambda i: (i, 0)),
        compiler_params=pltpu.CompilerParams(
            dimension_semantics=("parallel",),                 # megacore on v7x
        ),
        cost_estimate=pl.CostEstimate(
            flops=flops, transcendentals=0, bytes_accessed=bytes_accessed),
    )(x, params["w1"], params["b1"], w2, b2)

    return out[:B, :O]


# ------------------------- Deterministic parameter init ------------------------
def init_params(key, look_back, target_days, hidden=32):
    """PyTorch nn.Linear-style U(-1/sqrt(fan_in), 1/sqrt(fan_in)) init."""
    k1, k2, k3, k4 = jax.random.split(key, 4)
    lim1 = 1.0 / jnp.sqrt(jnp.float32(look_back))
    lim2 = 1.0 / jnp.sqrt(jnp.float32(hidden))
    # torch weights are (out, in); store transposed (in, out) for x @ W.
    w1 = jax.random.uniform(k1, (hidden, look_back), jnp.float32, -lim1, lim1)
    b1 = jax.random.uniform(k2, (hidden,), jnp.float32, -lim1, lim1)
    w2 = jax.random.uniform(k3, (target_days, hidden), jnp.float32, -lim2, lim2)
    b2 = jax.random.uniform(k4, (target_days,), jnp.float32, -lim2, lim2)
    return {
        "w1": jnp.transpose(w1),              # (look_back, hidden)
        "b1": b1.reshape(1, hidden),
        "w2": jnp.transpose(w2),              # (hidden, target_days)
        "b2": b2.reshape(1, target_days),
    }


# ------------------------------ Pure-JAX reference -----------------------------
def lstm_predictor_ref(x, params):
    h = jnp.maximum(x @ params["w1"] + params["b1"], 0.0)
    return h @ params["w2"] + params["b2"]


if __name__ == "__main__":
    # Small shapes consistent with the module's forward.
    batch, look_back, target_days = 2, 16, 8

    key = jax.random.PRNGKey(0)
    kx, kp, kb = jax.random.split(key, 3)
    x = jax.random.normal(kx, (batch, look_back), jnp.float32)
    params = init_params(kp, look_back, target_days)

    fwd = jax.jit(lstm_predictor_forward, static_argnames=("max_rows_per_block",))

    # 1) Tiny-batch path (B padded to one 8-row block, grid=(1,)).
    y = fwd(x, params)
    jax.block_until_ready(y)
    y_ref = lstm_predictor_ref(x, params)
    assert y.shape == (batch, target_days)
    assert jnp.allclose(y, y_ref, atol=1e-5, rtol=1e-5)

    # 2) Batched path exercising the 1-D grid (B=300 -> 3 blocks of 128 rows).
    xb = jax.random.normal(kb, (300, look_back), jnp.float32)
    yb = fwd(xb, params, max_rows_per_block=128)
    jax.block_until_ready(yb)
    yb_ref = lstm_predictor_ref(xb, params)
    assert yb.shape == (300, target_days)
    assert jnp.allclose(yb, yb_ref, atol=1e-5, rtol=1e-5)

    # TODO(synk): .predict()'s torch.no_grad()/.tolist() is host-side sugar; only
    # the forward pass is a kernel.
    print("KERNEL_OK")
</pallas_src>

<mosaic_0001>
module attributes {stable_mosaic.version = 11 : i64} {
  func.func @mlp_kernel(%arg0: i32, %arg1: memref<8x16xf32, #tpu.memory_space<vmem>>, %arg2: memref<16x32xf32, #tpu.memory_space<vmem>>, %arg3: memref<1x32xf32, #tpu.memory_space<vmem>>, %arg4: memref<32x128xf32, #tpu.memory_space<vmem>>, %arg5: memref<1x128xf32, #tpu.memory_space<vmem>>, %arg6: memref<8x128xf32, #tpu.memory_space<vmem>>) attributes {dimension_semantics = [#tpu.dimension_semantics<parallel>], iteration_bounds = array<i64: 1>, scalar_prefetch = 0 : i64, scratch_operands = 0 : i64, tpu.core_type = #tpu.core_type<tc>, window_params = [{transform_indices = @transform_0, window_bounds = array<i64: 8, 16>}, {pipeline_mode = #tpu.pipeline_mode<synchronous>, transform_indices = @transform_1, window_bounds = array<i64: 16, 32>}, {pipeline_mode = #tpu.pipeline_mode<synchronous>, transform_indices = @transform_2, window_bounds = array<i64: 1, 32>}, {pipeline_mode = #tpu.pipeline_mode<synchronous>, transform_indices = @transform_3, window_bounds = array<i64: 32, 128>}, {pipeline_mode = #tpu.pipeline_mode<synchronous>, transform_indices = @transform_4, window_bounds = array<i64: 1, 128>}, {transform_indices = @transform_5, window_bounds = array<i64: 8, 128>}]} {
    %c0 = arith.constant 0 : index
    %c0_0 = arith.constant 0 : index
    %0 = vector.load %arg1[%c0, %c0_0] : memref<8x16xf32, #tpu.memory_space<vmem>>, vector<8x16xf32>
    %c0_1 = arith.constant 0 : index
    %c0_2 = arith.constant 0 : index
    %1 = vector.load %arg2[%c0_1, %c0_2] : memref<16x32xf32, #tpu.memory_space<vmem>>, vector<16x32xf32>
    %cst = arith.constant dense<0.000000e+00> : vector<8x32xf32>
    %2 = tpu.matmul %0, %1, %cst {dimension_numbers = #tpu.dot_dimension_numbers<[1], [0], [0], [1], [0, 0, 1, 1], [], []>} : vector<8x16xf32>, vector<16x32xf32>, vector<8x32xf32> -> vector<8x32xf32>
    %c0_3 = arith.constant 0 : index
    %c0_4 = arith.constant 0 : index
    %3 = vector.load %arg3[%c0_3, %c0_4] : memref<1x32xf32, #tpu.memory_space<vmem>>, vector<1x32xf32>
    %4 = vector.broadcast %3 : vector<1x32xf32> to vector<8x32xf32>
    %5 = arith.addf %2, %4 : vector<8x32xf32>
    %cst_5 = arith.constant 0.000000e+00 : f32
    %6 = vector.broadcast %cst_5 : f32 to vector<8x32xf32>
    %7 = arith.maximumf %5, %6 : vector<8x32xf32>
    %c0_6 = arith.constant 0 : index
    %c0_7 = arith.constant 0 : index
    %8 = vector.load %arg4[%c0_6, %c0_7] : memref<32x128xf32, #tpu.memory_space<vmem>>, vector<32x128xf32>
    %cst_8 = arith.constant dense<0.000000e+00> : vector<8x128xf32>
    %9 = tpu.matmul %7, %8, %cst_8 {dimension_numbers = #tpu.dot_dimension_numbers<[1], [0], [0], [1], [0, 0, 1, 1], [], []>} : vector<8x32xf32>, vector<32x128xf32>, vector<8x128xf32> -> vector<8x128xf32>
    %c0_9 = arith.constant 0 : index
    %c0_10 = arith.constant 0 : index
    %10 = vector.load %arg5[%c0_9, %c0_10] : memref<1x128xf32, #tpu.memory_space<vmem>>, vector<1x128xf32>
    %11 = vector.broadcast %10 : vector<1x128xf32> to vector<8x128xf32>
    %12 = arith.addf %9, %11 : vector<8x128xf32>
    %c0_11 = arith.constant 0 : index
    %c0_12 = arith.constant 0 : index
    %13 = vector.load %arg6[%c0_11, %c0_12] : memref<8x128xf32, #tpu.memory_space<vmem>>, vector<8x128xf32>
    tpu.vector_store %arg6[%c0_11, %c0_12], %12 {strides = array<i32>} : memref<8x128xf32, #tpu.memory_space<vmem>>, vector<8x128xf32>,
    return
  }
  func.func @transform_0(%arg0: i32) -> (i32, i32) {
    %c0_i32 = arith.constant 0 : i32
    %c0_i32_0 = arith.constant 0 : i32
    return %arg0, %c0_i32 : i32, i32
  }
  func.func @transform_1(%arg0: i32) -> (i32, i32) {
    %c0_i32 = arith.constant 0 : i32
    %c0_i32_0 = arith.constant 0 : i32
    %c0_i32_1 = arith.constant 0 : i32
    return %c0_i32, %c0_i32_0 : i32, i32
  }
  func.func @transform_2(%arg0: i32) -> (i32, i32) {
    %c0_i32 = arith.constant 0 : i32
    %c0_i32_0 = arith.constant 0 : i32
    %c0_i32_1 = arith.constant 0 : i32
    return %c0_i32, %c0_i32_0 : i32, i32
  }
  func.func @transform_3(%arg0: i32) -> (i32, i32) {
    %c0_i32 = arith.constant 0 : i32
    %c0_i32_0 = arith.constant 0 : i32
    %c0_i32_1 = arith.constant 0 : i32
    return %c0_i32, %c0_i32_0 : i32, i32
  }
  func.func @transform_4(%arg0: i32) -> (i32, i32) {
    %c0_i32 = arith.constant 0 : i32
    %c0_i32_0 = arith.constant 0 : i32
    %c0_i32_1 = arith.constant 0 : i32
    return %c0_i32, %c0_i32_0 : i32, i32
  }
  func.func @transform_5(%arg0: i32) -> (i32, i32) {
    %c0_i32 = arith.constant 0 : i32
    %c0_i32_0 = arith.constant 0 : i32
    return %arg0, %c0_i32 : i32, i32
  }
}

</mosaic_0001>

<bundles_post_ra>
// kernel: lstm_predictor_forward.1
= control target key start
LH: loop header
LB: loop body
LE: loop exit
PB: predicated region body
PF: predicated region fallthrough
CT: control target
= control target key end

     0   :  { %v237_v0 = vmov 0.0|0.0   ;;  %vm238_vm0 = vmmov 0   ;;  %v239_v3 = vmov 0.0   ;;  %vm30_vm1 = vcmask 130048   ;;  %s300_s1 = inlined_call_operand.vmem [shape: f32[16,32], index: 1, kind: input, shape index: {}]   ;;  %s301_s3 = inlined_call_operand.vmem [shape: f32[32,128], index: 3, kind: input, shape index: {}]   ;;  %s302_s0 = inlined_call_operand.vmem [shape: f32[8,16], index: 0, kind: input, shape index: {}]   ;;  %s303_s2 = inlined_call_operand.vmem [shape: f32[1,32], index: 2, kind: input, shape index: {}]   ;;  %s304_s4 = inlined_call_operand.vmem [shape: f32[1,128], index: 4, kind: input, shape index: {}]   ;;  %s305_s5 = inlined_call_operand.vmem [shape: f32[8,128], index: 5, kind: output, shape index: {}]  }
   0x1   :  { %225 = vmatprep.subr.bf16.mxu0 %v237_v0  ;;  %v21_v1 = vld [vmem:[%s300_s1] sm:$0xff]  ;;  %v22_v2 = vld [vmem:[%s300_s1 + $0x8] sm:$0xff]  ;;  %211 = vmatprep.mubr.msk.f32.mxu0 %vm238_vm0, %v239_v3  ;;  %v107_v9 = vld [vmem:[%s301_s3 + $0x10] sm:$0xff]  ;;  %vm116_vm2 = vcmask 261120  }
   0x2   :  { %v226_v4 = vpack.c.bf16 %v22_v2, %v21_v1  ;;  %228 = vmatprep.subr.bf16.mxu1 %v237_v0  ;;  %v105_v5 = vld [vmem:[%s301_s3] sm:$0xff]  ;;  %v106_v6 = vld [vmem:[%s301_s3 + $0x8] sm:$0xff]  ;;  %222 = vmatprep.mubr.msk.f32.mxu1 %vm238_vm0, %v239_v3  ;;  %v108_v10 = vld [vmem:[%s301_s3 + $0x18] sm:$0xff] }
   0x3   :  { %v229_v7 = vpack.c.bf16 %v106_v6, %v105_v5  ;;  %v20_v8 = vld [vmem:[%s302_s0] sm:$0xff]  ;;  %v232_v11 = vpack.c.bf16 %v108_v10, %v107_v9 }
   0x4   :  { %227 = vmatpush3.bf16.msra.mxu0 %v226_v4  ;;  %v195_v12 = vld [vmem:[%s303_s2] ss:$0 sm:$0xff] }
   0x5   :  { %230 = vmatpush3.bf16.msra.mxu1 %v229_v7  ;;  %v197_v17 = vld [vmem:[%s304_s4] ss:$0 sm:$0xff] }
   0x6   :  { %231 = vmatprep.subr.bf16.mxu1 %v237_v0 }
   0x7   :  { %212 = vmatmul.mubr.msk.f32.vlgmr.msra.gmra.mrb[0].mxu0 %vm30_vm1, %v20_v8 }
   0x9   :  { %233 = vmatpush3.bf16.msra.mxu1 %v232_v11 }
  0xda   :  { %v100_v13 = vpop.f32.mrb[0].mxu0 }
  0xdb   :  { %v101_v14 = vadd.f32 %v195_v12, %v100_v13  ;;  %v213_v15 = vpop.f32.mrb[1].mxu0 }
  0xdd   :  { %v104_v16 = vmax.f32 %v101_v14, 0.0 }
  0xdf   :  { %223 = vmatmul.mubr.msk.f32.vlgmr.msra.gmra.mrb[0].mxu1 %vm116_vm2, %v104_v16 }
 0x1b2   :  { %v186_v18 = vpop.f32.mrb[0].mxu1 }
 0x1b3   :  { %v187_v19 = vadd.f32 %v197_v17, %v186_v18  ;;  %v224_v20 = vpop.f32.mrb[1].mxu1 }
 0x1b5   :  { %190 = vst [vmem:[%s305_s5] sm:$0xff] %v187_v19 }

</bundles_post_ra>
